<compile_context>
chip_gen: v5e
topology: v5e:2x2
jax: 0.10.0
libtpu: 0.0.40
codegen_flags: <defaults>
</compile_context>

<pallas_src>
import functools

import jax
import jax.numpy as jnp
from jax.experimental import pallas as pl
from jax.experimental.pallas import tpu as pltpu

_LANE = 128
_MAX_BLOCK_ROWS = 2048  # 2048 x 128 x f32 = 1 MiB per input block


def _sublane_align(dtype):
    """Second-minor block dim must be a multiple of 8 (f32) / 16 (bf16) / 32 (int8)."""
    itemsize = jnp.dtype(dtype).itemsize
    return 8 * max(1, 4 // itemsize)


def _dice_kernel(x_ref, t_ref, out_ref, inter_acc, sum_acc, *, activation):
    i = pl.program_id(1)

    @pl.when(i == 0)
    def _init():
        inter_acc[...] = jnp.zeros_like(inter_acc)
        sum_acc[...] = jnp.zeros_like(sum_acc)
        out_ref[...] = jnp.zeros_like(out_ref)

    x = x_ref[...].astype(jnp.float32)
    if activation is not None:
        x = activation(x)  # fused: transcendental lands on the otherwise-idle EUP slot
    t = t_ref[...].astype(jnp.float32)

    # Pure elementwise (VPU) accumulation; no per-step cross-lane reduction.
    inter_acc[...] += x * t
    sum_acc[...] += x + t

    @pl.when(i == pl.num_programs(1) - 1)
    def _finalize():
        # One sublane reduction per core at the very end; the tiny cross-lane reduce
        # and the dice formula happen in the JAX wrapper.
        out_ref[0:1, :] = jnp.sum(inter_acc[...], axis=0, keepdims=True)
        out_ref[1:2, :] = jnp.sum(sum_acc[...], axis=0, keepdims=True)


def dice_loss(inputs, targets, smooth=1.0, activation=None):
    """Pallas equivalent of DiceLoss.forward(inputs, targets)."""
    smooth = float(smooth)
    x_flat = inputs.reshape(-1)
    t_flat = targets.reshape(-1)
    n = x_flat.shape[0]

    align = max(_sublane_align(x_flat.dtype), _sublane_align(t_flat.dtype))
    rows_full = n // _LANE
    block_rows = min(_MAX_BLOCK_ROWS, (rows_full // align) * align)

    inter = jnp.float32(0.0)
    sum_xt = jnp.float32(0.0)

    if block_rows > 0:
        num_blocks = rows_full // block_rows
        split = 2 if (num_blocks >= 2 and num_blocks % 2 == 0) else 1
        blocks_per_core = num_blocks // split
        main_rows = num_blocks * block_rows
        main_elems = main_rows * _LANE

        x2 = x_flat[:main_elems].reshape(main_rows, _LANE)
        t2 = t_flat[:main_elems].reshape(main_rows, _LANE)

        kernel = functools.partial(_dice_kernel, activation=activation)
        in_map = lambda c, i: (c * blocks_per_core + i, 0)

        partials = pl.pallas_call(
            kernel,
            out_shape=jax.ShapeDtypeStruct((split, 8, _LANE), jnp.float32),
            grid_spec=pltpu.PrefetchScalarGridSpec(
                num_scalar_prefetch=0,
                grid=(split, blocks_per_core),
                in_specs=[
                    pl.BlockSpec((block_rows, _LANE), in_map),
                    pl.BlockSpec((block_rows, _LANE), in_map),
                ],
                out_specs=pl.BlockSpec((None, 8, _LANE), lambda c, i: (c, 0, 0)),
                scratch_shapes=[
                    pltpu.VMEM((block_rows, _LANE), jnp.float32),
                    pltpu.VMEM((block_rows, _LANE), jnp.float32),
                ],
            ),
            compiler_params=pltpu.CompilerParams(
                dimension_semantics=("parallel", "arbitrary"),
            ),
        )(x2, t2)

        inter = inter + jnp.sum(partials[:, 0, :])
        sum_xt = sum_xt + jnp.sum(partials[:, 1, :])
        tail_start = main_elems
    else:
        # Input too small for even one aligned block; handled entirely below.
        tail_start = 0

    if tail_start < n:
        # Sub-block remainder (and any n % 128 leftovers): plain JAX.  At most one
        # block worth of elements, so negligible extra HBM traffic; avoids padding /
        # copying the full array.
        xt = x_flat[tail_start:].astype(jnp.float32)
        tt = t_flat[tail_start:].astype(jnp.float32)
        if activation is not None:
            xt = activation(xt)
        inter = inter + jnp.sum(xt * tt)
        sum_xt = sum_xt + jnp.sum(xt) + jnp.sum(tt)

    dice = (2.0 * inter + smooth) / (sum_xt + smooth)
    return 1.0 - dice


def dice_loss_ref(inputs, targets, smooth=1.0, activation=None):
    """Pure-JAX reference matching DiceLoss.forward."""
    x = inputs.astype(jnp.float32).reshape(-1)
    t = targets.astype(jnp.float32).reshape(-1)
    if activation is not None:
        x = activation(x)
    intersection = jnp.sum(x * t)
    dice = (2.0 * intersection + smooth) / (jnp.sum(x) + jnp.sum(t) + smooth)
    return 1.0 - dice


if __name__ == "__main__":
    key = jax.random.PRNGKey(0)
    k1, k2, k3, k4, k5, k6 = jax.random.split(key, 6)
    k7, k8 = jax.random.split(k6)

    checks = []

    # 1) Small U-Net-like logits (NCHW = 2,4,16,16) with the sigmoid fused in-kernel.
    logits1 = jax.random.normal(k1, (2, 4, 16, 16), jnp.float32)
    targets1 = (jax.random.uniform(k2, (2, 4, 16, 16)) > 0.5).astype(jnp.float32)
    checks.append((logits1, targets1, 1.0, jax.nn.sigmoid))

    # 2) Native bf16 probabilities + f32 targets, no activation (mixed-dtype path).
    probs2 = jax.nn.sigmoid(jax.random.normal(k3, (2, 4, 16, 16))).astype(jnp.bfloat16)
    targets2 = (jax.random.uniform(k4, (2, 4, 16, 16)) > 0.5).astype(jnp.float32)
    checks.append((probs2, targets2, 1.0, None))

    # 3) Larger input: exercises the 2048-row blocks and the 2-way core-parallel split.
    logits3 = jax.random.normal(k5, (2, 4, 256, 256), jnp.float32)
    targets3 = (jax.random.uniform(k6, (2, 4, 256, 256)) > 0.5).astype(jnp.float32)
    checks.append((logits3, targets3, 1.0, jax.nn.sigmoid))

    # 4) Flat size not a multiple of the block: exercises the JAX tail path.
    probs4 = jax.nn.sigmoid(jax.random.normal(k7, (2, 4, 24, 24), jnp.float32))
    targets4 = (jax.random.uniform(k8, (2, 4, 24, 24)) > 0.5).astype(jnp.float32)
    checks.append((probs4, targets4, 2.0, None))

    for idx, (inp, tgt, smooth, act) in enumerate(checks):
        out = jax.block_until_ready(dice_loss(inp, tgt, smooth=smooth, activation=act))
        ref = jax.block_until_ready(dice_loss_ref(inp, tgt, smooth=smooth, activation=act))
        assert jnp.allclose(out, ref, rtol=1e-4, atol=1e-5), (idx, out, ref)

    print("KERNEL_OK")
</pallas_src>

<mosaic_0001>
module attributes {stable_mosaic.version = 11 : i64} {
  func.func @_dice_kernel(%arg0: i32, %arg1: i32, %arg2: memref<16x128xf32, #tpu.memory_space<vmem>>, %arg3: memref<16x128xf32, #tpu.memory_space<vmem>>, %arg4: memref<1x8x128xf32, #tpu.memory_space<vmem>>, %arg5: memref<16x128xf32, #tpu.memory_space<vmem>>, %arg6: memref<16x128xf32, #tpu.memory_space<vmem>>) attributes {dimension_semantics = [#tpu.dimension_semantics<parallel>, #tpu.dimension_semantics<arbitrary>], iteration_bounds = array<i64: 1, 1>, scalar_prefetch = 0 : i64, scratch_operands = 2 : i64, tpu.core_type = #tpu.core_type<tc>, window_params = [{transform_indices = @transform_0, window_bounds = array<i64: 16, 128>}, {transform_indices = @transform_1, window_bounds = array<i64: 16, 128>}, {transform_indices = @transform_2, window_bounds = array<i64: 1, 8, 128>}]} {
    %c0_i32 = arith.constant 0 : i32
    %0 = arith.cmpi eq, %arg1, %c0_i32 : i32
    %1 = arith.extui %0 : i1 to i32
    %c0_i32_0 = arith.constant 0 : i32
    %2 = arith.cmpi ne, %1, %c0_i32_0 : i32
    scf.if %2 {
      %cst_14 = arith.constant 0.000000e+00 : f32
      %21 = vector.broadcast %cst_14 : f32 to vector<16x128xf32>
      %c0_15 = arith.constant 0 : index
      %c0_16 = arith.constant 0 : index
      %22 = vector.load %arg5[%c0_15, %c0_16] : memref<16x128xf32, #tpu.memory_space<vmem>>, vector<16x128xf32>
      tpu.vector_store %arg5[%c0_15, %c0_16], %21 {strides = array<i32>} : memref<16x128xf32, #tpu.memory_space<vmem>>, vector<16x128xf32>,
      %cst_17 = arith.constant 0.000000e+00 : f32
      %23 = vector.broadcast %cst_17 : f32 to vector<16x128xf32>
      %c0_18 = arith.constant 0 : index
      %c0_19 = arith.constant 0 : index
      %24 = vector.load %arg6[%c0_18, %c0_19] : memref<16x128xf32, #tpu.memory_space<vmem>>, vector<16x128xf32>
      tpu.vector_store %arg6[%c0_18, %c0_19], %23 {strides = array<i32>} : memref<16x128xf32, #tpu.memory_space<vmem>>, vector<16x128xf32>,
      %cst_20 = arith.constant 0.000000e+00 : f32
      %25 = vector.broadcast %cst_20 : f32 to vector<8x128xf32>
      %c0_21 = arith.constant 0 : index
      %c0_22 = arith.constant 0 : index
      %c0_23 = arith.constant 0 : index
      %26 = vector.load %arg4[%c0_21, %c0_22, %c0_23] : memref<1x8x128xf32, #tpu.memory_space<vmem>>, vector<1x8x128xf32>
      %27 = vector.shape_cast %26 : vector<1x8x128xf32> to vector<8x128xf32>
      %28 = vector.shape_cast %25 : vector<8x128xf32> to vector<1x8x128xf32>
      tpu.vector_store %arg4[%c0_21, %c0_22, %c0_23], %28 {strides = array<i32>} : memref<1x8x128xf32, #tpu.memory_space<vmem>>, vector<1x8x128xf32>,
    } else {
    }
    %c0 = arith.constant 0 : index
    %c0_1 = arith.constant 0 : index
    %3 = vector.load %arg2[%c0, %c0_1] : memref<16x128xf32, #tpu.memory_space<vmem>>, vector<16x128xf32>
    %4 = arith.negf %3 : vector<16x128xf32>
    %5 = math.exp %4 : vector<16x128xf32>
    %cst = arith.constant 1.000000e+00 : f32
    %6 = vector.broadcast %cst : f32 to vector<16x128xf32>
    %7 = arith.addf %6, %5 : vector<16x128xf32>
    %8 = arith.divf %6, %7 : vector<16x128xf32>
    %c0_2 = arith.constant 0 : index
    %c0_3 = arith.constant 0 : index
    %9 = vector.load %arg3[%c0_2, %c0_3] : memref<16x128xf32, #tpu.memory_space<vmem>>, vector<16x128xf32>
    %c0_4 = arith.constant 0 : index
    %c0_5 = arith.constant 0 : index
    %10 = vector.load %arg5[%c0_4, %c0_5] : memref<16x128xf32, #tpu.memory_space<vmem>>, vector<16x128xf32>
    %11 = arith.mulf %8, %9 : vector<16x128xf32>
    %12 = arith.addf %10, %11 : vector<16x128xf32>
    %c0_6 = arith.constant 0 : index
    %c0_7 = arith.constant 0 : index
    %13 = vector.load %arg5[%c0_6, %c0_7] : memref<16x128xf32, #tpu.memory_space<vmem>>, vector<16x128xf32>
    tpu.vector_store %arg5[%c0_6, %c0_7], %12 {strides = array<i32>} : memref<16x128xf32, #tpu.memory_space<vmem>>, vector<16x128xf32>,
    %c0_8 = arith.constant 0 : index
    %c0_9 = arith.constant 0 : index
    %14 = vector.load %arg6[%c0_8, %c0_9] : memref<16x128xf32, #tpu.memory_space<vmem>>, vector<16x128xf32>
    %15 = arith.addf %8, %9 : vector<16x128xf32>
    %16 = arith.addf %14, %15 : vector<16x128xf32>
    %c0_10 = arith.constant 0 : index
    %c0_11 = arith.constant 0 : index
    %17 = vector.load %arg6[%c0_10, %c0_11] : memref<16x128xf32, #tpu.memory_space<vmem>>, vector<16x128xf32>
    tpu.vector_store %arg6[%c0_10, %c0_11], %16 {strides = array<i32>} : memref<16x128xf32, #tpu.memory_space<vmem>>, vector<16x128xf32>,
    %c0_i32_12 = arith.constant 0 : i32
    %18 = arith.cmpi eq, %arg1, %c0_i32_12 : i32
    %19 = arith.extui %18 : i1 to i32
    %c0_i32_13 = arith.constant 0 : i32
    %20 = arith.cmpi ne, %19, %c0_i32_13 : i32
    scf.if %20 {
      %c0_14 = arith.constant 0 : index
      %c0_15 = arith.constant 0 : index
      %21 = vector.load %arg5[%c0_14, %c0_15] : memref<16x128xf32, #tpu.memory_space<vmem>>, vector<16x128xf32>
      %cst_16 = arith.constant dense<0.000000e+00> : vector<128xf32>
      %22 = vector.multi_reduction <add>, %21, %cst_16 [0] : vector<16x128xf32> to vector<128xf32>
      %23 = vector.shape_cast %22 : vector<128xf32> to vector<1x128xf32>
      %c0_17 = arith.constant 0 : index
      %c0_18 = arith.constant 0 : index
      %c0_19 = arith.constant 0 : index
      %24 = vector.load %arg4[%c0_17, %c0_18, %c0_19] : memref<1x8x128xf32, #tpu.memory_space<vmem>>, vector<1x1x128xf32>
      %25 = vector.shape_cast %24 : vector<1x1x128xf32> to vector<1x128xf32>
      %26 = vector.shape_cast %23 : vector<1x128xf32> to vector<1x1x128xf32>
      tpu.vector_store %arg4[%c0_17, %c0_18, %c0_19], %26 {strides = array<i32>} : memref<1x8x128xf32, #tpu.memory_space<vmem>>, vector<1x1x128xf32>,
      %c0_20 = arith.constant 0 : index
      %c0_21 = arith.constant 0 : index
      %27 = vector.load %arg6[%c0_20, %c0_21] : memref<16x128xf32, #tpu.memory_space<vmem>>, vector<16x128xf32>
      %cst_22 = arith.constant dense<0.000000e+00> : vector<128xf32>
      %28 = vector.multi_reduction <add>, %27, %cst_22 [0] : vector<16x128xf32> to vector<128xf32>
      %29 = vector.shape_cast %28 : vector<128xf32> to vector<1x128xf32>
      %c0_23 = arith.constant 0 : index
      %c1 = arith.constant 1 : index
      %c0_24 = arith.constant 0 : index
      %30 = vector.load %arg4[%c0_23, %c1, %c0_24] : memref<1x8x128xf32, #tpu.memory_space<vmem>>, vector<1x1x128xf32>
      %31 = vector.shape_cast %30 : vector<1x1x128xf32> to vector<1x128xf32>
      %32 = vector.shape_cast %29 : vector<1x128xf32> to vector<1x1x128xf32>
      tpu.vector_store %arg4[%c0_23, %c1, %c0_24], %32 {strides = array<i32>} : memref<1x8x128xf32, #tpu.memory_space<vmem>>, vector<1x1x128xf32>,
    } else {
    }
    return
  }
  func.func @transform_0(%arg0: i32, %arg1: i32) -> (i32, i32) {
    %c1_i32 = arith.constant 1 : i32
    %0 = arith.muli %arg0, %c1_i32 : i32
    %1 = arith.addi %0, %arg1 : i32
    %c0_i32 = arith.constant 0 : i32
    %c0_i32_0 = arith.constant 0 : i32
    return %1, %c0_i32 : i32, i32
  }
  func.func @transform_1(%arg0: i32, %arg1: i32) -> (i32, i32) {
    %c1_i32 = arith.constant 1 : i32
    %0 = arith.muli %arg0, %c1_i32 : i32
    %1 = arith.addi %0, %arg1 : i32
    %c0_i32 = arith.constant 0 : i32
    %c0_i32_0 = arith.constant 0 : i32
    return %1, %c0_i32 : i32, i32
  }
  func.func @transform_2(%arg0: i32, %arg1: i32) -> (i32, i32, i32) {
    %c0_i32 = arith.constant 0 : i32
    %c0_i32_0 = arith.constant 0 : i32
    %c0_i32_1 = arith.constant 0 : i32
    return %arg0, %c0_i32, %c0_i32_0 : i32, i32, i32
  }
}

</mosaic_0001>

<bundles_post_ra>
// kernel: tpu_custom_call.1
= control target key start
LH: loop header
LB: loop body
LE: loop exit
PB: predicated region body
PF: predicated region fallthrough
CT: control target
= control target key end

     0   :  { %7 = vsyncpa [#allocation5], 0  ;;  %s288_s0 = inlined_call_operand.hbm [shape: f32[16,128], index: 0, kind: input, shape index: {}]   ;;  %s289_s1 = inlined_call_operand.hbm [shape: f32[16,128], index: 1, kind: input, shape index: {}]   ;;  %s290_s2 = inlined_call_operand.hbm [shape: f32[1,8,128], index: 2, kind: output, shape index: {}]  }
   0x1   :  { %8 = vsyncpa [#allocation8], 0 }
   0x2   :  { %9 = vsyncpa [#allocation6], 0  ;;  %s18_s11 = sshll.u32 %s288_s0, 4  ;;  %s258_s12 = smov [#allocation4]   ;;  %s19_s11 = int_to_ptr.hbm [resolvable:$true] %s18_s11 }
   0x3   :  { %s20_s13 = sshll.u32 %s258_s12, 4  ;;  %s35_s16 = sshll.u32 %s289_s1, 4  ;;  %s21_s13 = int_to_ptr.vmem [resolvable:$true] %s20_s13  ;;  %s36_s16 = int_to_ptr.hbm [resolvable:$true] %s35_s16 }
   0x4   :  { %s259_s17 = smov 128   ;;  %s260_s18 = smov 8  }
   0x5   :  { %26 = dma.hbm_to_vmem [thread:$0]  %s19_s11, 256, %s21_s13, [#allocation5], %s259_s17, %s259_s17, %s260_s18  }
   0x6   :  { %s261_s19 = smov [#allocation7]  }
   0x7   :  { %s37_s20 = sshll.u32 %s261_s19, 4  ;;  %s38_s20 = int_to_ptr.vmem [resolvable:$true] %s37_s20 }
   0x8   :  { %43 = dma.hbm_to_vmem [thread:$0]  %s36_s16, 256, %s38_s20, [#allocation8], %s259_s17, %s259_s17, %s260_s18  }
   0x9   :  { %252 = dma.done.wait [#allocation5], 256  }
   0xa   :  { %253 = vsyncadd [#allocation5], 4294967040 }
   0xb   :  { %254 = dma.done.wait [#allocation8], 256  }
   0xc   :  { %255 = vsyncadd [#allocation8], 4294967040  ;;  %v262_v0 = vmov 0.0   ;;  %v65_v1 = vld [vmem:[#allocation4] sm:$0xff]  ;;  %v66_v2 = vld [vmem:[#allocation4 + $0x8] sm:$0xff]  ;;  %s263_s0 = smov [#allocation9]  }
   0xd   :  { %64 = vst [vmem:[#allocation9] sm:$0xff] %v262_v0  ;;  %v164_v3 = vmul.f32 -1.442695, %v65_v1  ;;  %v165_v4 = vmul.f32 -1.442695, %v66_v2  ;;  %v105_v25 = vld [vmem:[#allocation7] sm:$0xff] }
   0xe   :  { %v106_v27 = vld [vmem:[#allocation7 + $0x8] sm:$0xff]  ;;  %s151_s1 = sshll.u32 %s263_s0, 4  ;;  %s153_s23 = sshll.u32 %s290_s2, 4  ;;  %s152_s1 = int_to_ptr.vmem [resolvable:$true] %s151_s1  ;;  %s154_s23 = int_to_ptr.hbm [resolvable:$true] %s153_s23 }
   0xf   :  { %172 = vpow2.f32 %v164_v3 }
  0x10   :  { %174 = vpow2.f32 %v165_v4 }
  0x15   :  { %v173_v5 = vpop.eup %172 }
  0x16   :  { %v175_v6 = vpop.eup %174  ;;  %v73_v7 = vadd.f32 1.0, %v173_v5 }
  0x17   :  { %v74_v8 = vadd.f32 1.0, %v175_v6 }
  0x18   :  { %176 = vrcp.f32 %v73_v7  ;;  %vm80_vm0 = vweird.f32 %v73_v7  ;;  %v86_v12 = vand.u32 2147483648, %v73_v7  ;;  %v84_v15 = vand.u32 2147483647, %v73_v7 }
  0x19   :  { %178 = vrcp.f32 %v74_v8  ;;  %v101_v16 = vand.u32 2147483648, %v74_v8  ;;  %vm95_vm2 = vweird.f32 %v74_v8  ;;  %v99_v18 = vand.u32 2147483647, %v74_v8 }
  0x1a   :  { %v87_v20 = vor.u32 1.1754944e-38, %v86_v12  ;;  %vm85_vm5 = vcmp.eq.f32.partialorder %v84_v15, 8.507059e+37 }
  0x1b   :  { %v102_v23 = vor.u32 1.1754944e-38, %v101_v16  ;;  %vm100_vm7 = vcmp.eq.f32.partialorder %v99_v18, 8.507059e+37 }
  0x1e   :  { %v177_v9 = vpop.eup %176 }
  0x1f   :  { %v179_v10 = vpop.eup %178  ;;  %v76_v11 = vmul.f32 %v177_v9, %v73_v7  ;;  %vm81_vm1 = vweird.f32 %v177_v9 }
  0x20   :  { %v91_v13 = vmul.f32 %v179_v10, %v74_v8  ;;  %vm96_vm3 = vweird.f32 %v179_v10  ;;  %vm82_vm4 = vmor %vm80_vm0, %vm81_vm1 }
  0x21   :  { %v77_v14 = vsub.f32 1.0, %v76_v11  ;;  %vm97_vm6 = vmor %vm95_vm2, %vm96_vm3 }
  0x22   :  { %v92_v17 = vsub.f32 1.0, %v91_v13 }
  0x23   :  { %v78_v19 = vmul.f32 %v177_v9, %v77_v14 }
  0x24   :  { %v93_v21 = vmul.f32 %v179_v10, %v92_v17 }
  0x25   :  { %v79_v22 = vadd.f32 %v177_v9, %v78_v19 }
  0x26   :  { %v94_v24 = vadd.f32 %v179_v10, %v93_v21 }
  0x27   :  { %v83_v26 = vsel %vm82_vm4, %v177_v9, %v79_v22 }
  0x28   :  { %v88_v28 = vsel %vm85_vm5, %v87_v20, %v83_v26  ;;  %v98_v29 = vsel %vm97_vm6, %v179_v10, %v94_v24 }
  0x29   :  { %v103_v30 = vsel %vm100_vm7, %v102_v23, %v98_v29  ;;  %v109_v31 = vmul.f32 %v105_v25, %v88_v28  ;;  %v117_v32 = vadd.f32 %v105_v25, %v88_v28 }
  0x2a   :  { %v110_v33 = vmul.f32 %v106_v27, %v103_v30  ;;  %v118_v34 = vadd.f32 %v106_v27, %v103_v30 }
  0x2c   :  { %v128_v35 = vadd.f32 %v110_v33, %v109_v31  ;;  %v138_v36 = vadd.f32 %v118_v34, %v117_v32 }
  0x2e   :  { %v129_v37 = vrot.slane %v128_v35, 4  ;;  %v139_v38 = vrot.slane %v138_v36, 4 }
  0x30   :  { %v130_v39 = vadd.f32 %v129_v37, %v128_v35  ;;  %v140_v40 = vadd.f32 %v139_v38, %v138_v36 }
  0x32   :  { %v131_v41 = vrot.slane %v130_v39, 2  ;;  %v141_v42 = vrot.slane %v140_v40, 2 }
  0x34   :  { %v132_v43 = vadd.f32 %v131_v41, %v130_v39  ;;  %v142_v44 = vadd.f32 %v141_v42, %v140_v40 }
  0x36   :  { %v133_v45 = vrot.slane %v132_v43, 1  ;;  %v143_v46 = vrot.slane %v142_v44, 1 }
  0x38   :  { %v134_v47 = vadd.f32 %v133_v45, %v132_v43  ;;  %v144_v48 = vadd.f32 %v143_v46, %v142_v44 }
  0x3a   :  { %135 = vst [vmem:[#allocation9] sm:$0x1] %v134_v47 }
  0x3b   :  { %145 = vst [vmem:[#allocation9 + $0x1] sm:$0x1] %v144_v48 }
  0x3c   :  { %156 = dma.vmem_to_hbm [thread:$0]  %s152_s1, 128, %s154_s23, [#allocation6]  }
  0x3d   :  { %256 = dma.done.wait [#allocation6], 128  }
  0x3e   :  { %257 = vsyncadd [#allocation6], 4294967168 }
  0x3f   :  { %161 = vsyncpa [#allocation5], 1 }
  0x40   :  { %162 = vsyncpa [#allocation8], 1 }
  0x41   :  { %163 = vsyncpa [#allocation6], 1 }

</bundles_post_ra>
